<compile_context>
chip_gen: v6e
topology: v6e:2x2x1
jax: 0.10.0
libtpu: 0.0.40
codegen_flags: <defaults>
</compile_context>

<pallas_src>
import math

import numpy as np

import jax
import jax.numpy as jnp
from jax.experimental import pallas as pl
from jax.experimental.pallas import tpu as pltpu


def _round_up(x, m):
    return (x + m - 1) // m * m


def _vmem_budget():
    """(working-set budget, vmem_limit_bytes) from the actual chip's VMEM capacity."""
    cap = 64 * 1024 * 1024                     # v7x-safe fallback
    try:
        info = pltpu.get_tpu_info()
        cap = int(getattr(info, "vmem_capacity_bytes", cap))
    except Exception:
        pass
    return int(cap * 0.55), int(cap * 0.75)


def _pick_dst_tile(n_nodes, k_p, i_p, o_p, n_rel, itemsize, budget_bytes):
    """Largest dst tile (multiple of 16, bf16 sublane packing) whose VMEM working set
    fits the budget.  Every BlockSpec'd operand is counted double-buffered (Pallas
    default), including the constant-index resident ones."""
    cap = _round_up(max(n_nodes, 16), 16)
    est = 0
    for cand in (512, 256, 128, 64, 32, 16):
        tn = min(cand, cap)
        est = 2 * itemsize * (tn * k_p                 # adj block (streamed)
                              + k_p * i_p              # x (resident)
                              + n_rel * i_p * o_p)     # w (resident)
        est += 2 * 4 * (2 * tn * o_p)                  # f32 init + out blocks
        if est <= budget_bytes:
            return tn, est
    raise ValueError(
        "RGCN Pallas kernel: VMEM working set does not fit even with a 16-row dst tile "
        f"(~{est} bytes > budget {budget_bytes}). "
        "TODO(synk): add src (K) tiling for this regime.")


def _build_block_table(dst, etype, n_nodes, n_rel, tn):
    """Compacted, tile-sorted list of nonzero (dst-tile, relation) adjacency blocks.

    Uses the concrete (host-side) graph structure.  Empty dst tiles get one init-only
    dummy step so every output block is written exactly once.
    """
    dst = np.asarray(dst)
    etype = np.asarray(etype)
    n_tiles = _round_up(n_nodes, tn) // tn
    occ = np.zeros((n_tiles, n_rel), dtype=bool)
    if dst.size:
        occ[dst // tn, etype] = True

    tiles, rels, firsts, valids = [], [], [], []
    for t in range(n_tiles):
        rs = np.nonzero(occ[t])[0]
        if rs.size == 0:
            tiles.append(t); rels.append(0); firsts.append(1); valids.append(0)
        else:
            for j, r in enumerate(rs):
                tiles.append(t); rels.append(int(r))
                firsts.append(1 if j == 0 else 0); valids.append(1)

    as_i32 = lambda a: jnp.asarray(np.asarray(a, np.int32))
    return as_i32(tiles), as_i32(rels), as_i32(firsts), as_i32(valids), len(tiles)


def _rgcn_kernel(tile_ref, rel_ref, first_ref, valid_ref,
                 adj_ref, x_ref, w_ref, init_ref, out_ref):
    """Flat grid over nonzero (dst-tile, relation) adjacency blocks, sorted by tile.

    adj_ref : (TN, Kp)     bf16  nonzero adjacency block (dst-tile rows, all src cols)
    x_ref   : (Kp, Ip)     bf16  node features, VMEM-resident
    w_ref   : (R, Ip, Op)  bf16  per-relation weights (att @ basis), VMEM-resident
    init_ref: (TN, Op)     f32   self term x @ root + bias for this dst tile
    out_ref : (TN, Op)     f32   same block across a tile's steps -> accumulator
    """
    s = pl.program_id(0)
    rel = rel_ref[s]

    @pl.when(first_ref[s] == 1)
    def _init():
        # First step for this dst tile: accumulator starts at the self term + bias.
        out_ref[...] = init_ref[...]

    @pl.when(valid_ref[s] == 1)
    def _accumulate():
        # Neighbour aggregation for relation `rel`: h[v] = sum_u adj[rel, v, u] * x[u]
        h = jnp.dot(adj_ref[...], x_ref[...], preferred_element_type=jnp.float32)
        # Per-relation projection, accumulated directly into the output block.
        out_ref[...] += jnp.dot(h.astype(w_ref.dtype), w_ref[rel],
                                preferred_element_type=jnp.float32)


def rgcn_spmv_forward(x, src, dst, etype, norm, att, basis, root, bias, *,
                      compute_dtype=jnp.bfloat16):
    """out = sum_r (adj[r] @ x) @ (sum_b att[r,b] basis[b]) + x @ root + bias.

    src/dst/etype must be concrete (the graph structure is used host-side to build the
    sparsity block table; the graph is fixed across forward passes in RGCN training).
    """
    N, I = x.shape
    R = att.shape[0]
    O = basis.shape[2]
    cd = compute_dtype
    itemsize = jnp.dtype(cd).itemsize

    # Lane-dense channel padding; src (K) padding decoupled from the dst tile size.
    i_p = _round_up(I, 128)
    o_p = _round_up(O, 128)
    k_p = _round_up(N, 128)

    budget, vmem_limit = _vmem_budget()
    tn, _ = _pick_dst_tile(N, k_p, i_p, o_p, R, itemsize, budget)
    n_dst_p = _round_up(N, tn)

    # Sparsity block table (scalar-prefetched into SMEM).
    tiles, rels, firsts, valids, n_steps = _build_block_table(dst, etype, N, R, tn)

    # Basis combination hoisted out of the kernel (done once, VMEM-resident).
    w = jnp.einsum("rb,bio->rio", att, basis)
    w_p = jnp.zeros((R, i_p, o_p), cd).at[:, :I, :O].set(w.astype(cd))

    x_p = jnp.zeros((k_p, i_p), cd).at[:N, :I].set(x.astype(cd))

    # Adjacency scatter-added directly into the padded buffer (f32 sums keep the 1/deg
    # norm accumulation exact; a single cast to the streaming dtype follows).
    adj_p = jnp.zeros((R, n_dst_p, k_p), jnp.float32).at[etype, dst, src].add(norm)
    adj_p = adj_p.astype(cd)

    # Self connection + bias in exact f32, used as the per-tile accumulator init.
    init_p = jnp.zeros((n_dst_p, o_p), jnp.float32).at[:N, :O].set(
        x.astype(jnp.float32) @ root.astype(jnp.float32) + bias.astype(jnp.float32))

    grid_spec = pltpu.PrefetchScalarGridSpec(
        num_scalar_prefetch=4,
        grid=(n_steps,),
        in_specs=[
            # adj: the current nonzero (dst-tile, relation) block only.
            pl.BlockSpec((pl.Squeezed(), tn, k_p),
                         lambda s, t, r, f, v: (r[s], t[s], 0)),
            # x / w: full, resident (constant block index -> fetched once).
            pl.BlockSpec((k_p, i_p), lambda s, t, r, f, v: (0, 0)),
            pl.BlockSpec((R, i_p, o_p), lambda s, t, r, f, v: (0, 0, 0)),
            # self-term init: same block mapping as the output tile.
            pl.BlockSpec((tn, o_p), lambda s, t, r, f, v: (t[s], 0)),
        ],
        # Same output block across a tile's consecutive steps -> acts as the accumulator.
        out_specs=pl.BlockSpec((tn, o_p), lambda s, t, r, f, v: (t[s], 0)),
    )

    out_padded = pl.pallas_call(
        _rgcn_kernel,
        out_shape=jax.ShapeDtypeStruct((n_dst_p, o_p), jnp.float32),
        grid_spec=grid_spec,
        compiler_params=pltpu.CompilerParams(
            dimension_semantics=("arbitrary",),
            vmem_limit_bytes=vmem_limit,
        ),
    )(tiles, rels, firsts, valids, adj_p, x_p, w_p, init_p)

    return out_padded[:N, :O]


if __name__ == "__main__":
    key = jax.random.PRNGKey(0)

    # Small synthetic graph + module config.
    N, E = 16, 48
    in_channels, out_channels = 32, 64
    num_relations, num_bases = 4, 2

    keys = jax.random.split(key, 8)

    # Deterministic init mimicking reset_parameters(): uniform(-1/sqrt(size), 1/sqrt(size)).
    size = num_bases * in_channels
    bound = 1.0 / math.sqrt(size)
    basis = jax.random.uniform(keys[0], (num_bases, in_channels, out_channels),
                               jnp.float32, -bound, bound)
    att = jax.random.uniform(keys[1], (num_relations, num_bases),
                             jnp.float32, -bound, bound)
    root = jax.random.uniform(keys[2], (in_channels, out_channels),
                              jnp.float32, -bound, bound)
    bias = jax.random.uniform(keys[3], (out_channels,), jnp.float32, -bound, bound)

    # Synthetic graph data (what DGL's g would carry).
    x = jax.random.normal(keys[4], (N, in_channels), jnp.float32)
    src = jax.random.randint(keys[5], (E,), 0, N)
    dst = jax.random.randint(keys[6], (E,), 0, N)
    etype = jax.random.randint(keys[7], (E,), 0, num_relations)
    deg = jnp.zeros((N,), jnp.float32).at[dst].add(1.0)
    norm = 1.0 / jnp.maximum(deg[dst], 1.0)   # typical RGCN edge norm = 1/in-degree

    out = rgcn_spmv_forward(x, src, dst, etype, norm, att, basis, root, bias)
    out = jax.block_until_ready(out)
    assert out.shape == (N, out_channels)

    # Reference 1: exact f32 edge-wise reference (matches the PyTorch msg_func). Loose
    # tolerance because the kernel streams adj/x/w in bf16 (f32 accumulation).
    w = jnp.einsum("rb,bio->rio", att, basis)
    m = jnp.einsum("ei,eio->eo", x[src], w[etype]) * norm[:, None]
    agg = jnp.zeros((N, out_channels), jnp.float32).at[dst].add(m)
    ref_f32 = agg + x @ root + bias
    err_f32 = float(jnp.abs(out - ref_f32).max())
    assert jnp.allclose(out, ref_f32, atol=1e-1, rtol=1e-1), err_f32

    # Reference 2: matched precision (bf16-rounded adj/x/w, exact f32 self term) -> tight.
    cd = jnp.bfloat16
    adj = jnp.zeros((num_relations, N, N), jnp.float32).at[etype, dst, src].add(norm)
    adj_c = adj.astype(cd).astype(jnp.float32)
    x_c = x.astype(cd).astype(jnp.float32)
    w_c = w.astype(cd).astype(jnp.float32)
    h_c = jnp.einsum("rvu,ui->rvi", adj_c, x_c).astype(cd).astype(jnp.float32)
    ref_bf = jnp.einsum("rvi,rio->vo", h_c, w_c) + x @ root + bias
    err_bf = float(jnp.abs(out - ref_bf).max())
    assert jnp.allclose(out, ref_bf, atol=2e-2, rtol=2e-2), err_bf

    print("KERNEL_OK")
</pallas_src>

<mosaic_0001>
module attributes {stable_mosaic.version = 11 : i64} {
  func.func @_rgcn_kernel(%arg0: i32, %arg1: memref<4xi32, #tpu.memory_space<smem>>, %arg2: memref<4xi32, #tpu.memory_space<smem>>, %arg3: memref<4xi32, #tpu.memory_space<smem>>, %arg4: memref<4xi32, #tpu.memory_space<smem>>, %arg5: memref<1x16x128xbf16, #tpu.memory_space<vmem>>, %arg6: memref<128x128xbf16, #tpu.memory_space<vmem>>, %arg7: memref<4x128x128xbf16, #tpu.memory_space<vmem>>, %arg8: memref<16x128xf32, #tpu.memory_space<vmem>>, %arg9: memref<16x128xf32, #tpu.memory_space<vmem>>) attributes {dimension_semantics = [#tpu.dimension_semantics<arbitrary>], iteration_bounds = array<i64: 4>, scalar_prefetch = 4 : i64, scratch_operands = 0 : i64, tpu.core_type = #tpu.core_type<tc>, window_params = [{transform_indices = @transform_0, window_bounds = array<i64: 1, 16, 128>}, {pipeline_mode = #tpu.pipeline_mode<synchronous>, transform_indices = @transform_1, window_bounds = array<i64: 128, 128>}, {pipeline_mode = #tpu.pipeline_mode<synchronous>, transform_indices = @transform_2, window_bounds = array<i64: 4, 128, 128>}, {transform_indices = @transform_3, window_bounds = array<i64: 16, 128>}, {transform_indices = @transform_4, window_bounds = array<i64: 16, 128>}]} {
    %0 = arith.index_cast %arg0 : i32 to index
    %1 = memref.load %arg2[%0] : memref<4xi32, #tpu.memory_space<smem>>
    %2 = arith.index_cast %arg0 : i32 to index
    %3 = memref.load %arg3[%2] : memref<4xi32, #tpu.memory_space<smem>>
    %c1_i32 = arith.constant 1 : i32
    %4 = arith.cmpi eq, %3, %c1_i32 : i32
    %5 = arith.extui %4 : i1 to i32
    %c0_i32 = arith.constant 0 : i32
    %6 = arith.cmpi ne, %5, %c0_i32 : i32
    scf.if %6 {
      %c0 = arith.constant 0 : index
      %c0_2 = arith.constant 0 : index
      %12 = vector.load %arg8[%c0, %c0_2] : memref<16x128xf32, #tpu.memory_space<vmem>>, vector<16x128xf32>
      %c0_3 = arith.constant 0 : index
      %c0_4 = arith.constant 0 : index
      %13 = vector.load %arg9[%c0_3, %c0_4] : memref<16x128xf32, #tpu.memory_space<vmem>>, vector<16x128xf32>
      tpu.vector_store %arg9[%c0_3, %c0_4], %12 {strides = array<i32>} : memref<16x128xf32, #tpu.memory_space<vmem>>, vector<16x128xf32>,
    } else {
    }
    %7 = arith.index_cast %arg0 : i32 to index
    %8 = memref.load %arg4[%7] : memref<4xi32, #tpu.memory_space<smem>>
    %c1_i32_0 = arith.constant 1 : i32
    %9 = arith.cmpi eq, %8, %c1_i32_0 : i32
    %10 = arith.extui %9 : i1 to i32
    %c0_i32_1 = arith.constant 0 : i32
    %11 = arith.cmpi ne, %10, %c0_i32_1 : i32
    scf.if %11 {
      %c0 = arith.constant 0 : index
      %c0_2 = arith.constant 0 : index
      %c0_3 = arith.constant 0 : index
      %12 = vector.load %arg5[%c0, %c0_2, %c0_3] : memref<1x16x128xbf16, #tpu.memory_space<vmem>>, vector<1x16x128xbf16>
      %13 = vector.shape_cast %12 : vector<1x16x128xbf16> to vector<16x128xbf16>
      %c0_4 = arith.constant 0 : index
      %c0_5 = arith.constant 0 : index
      %14 = vector.load %arg6[%c0_4, %c0_5] : memref<128x128xbf16, #tpu.memory_space<vmem>>, vector<128x128xbf16>
      %cst = arith.constant dense<0.000000e+00> : vector<16x128xf32>
      %15 = tpu.matmul %13, %14, %cst {dimension_numbers = #tpu.dot_dimension_numbers<[1], [0], [0], [1], [0, 0, 1, 1], [], []>} : vector<16x128xbf16>, vector<128x128xbf16>, vector<16x128xf32> -> vector<16x128xf32>
      %c0_6 = arith.constant 0 : index
      %c0_7 = arith.constant 0 : index
      %16 = vector.load %arg9[%c0_6, %c0_7] : memref<16x128xf32, #tpu.memory_space<vmem>>, vector<16x128xf32>
      %17 = arith.truncf %15 : vector<16x128xf32> to vector<16x128xbf16>
      %18 = arith.index_cast %1 : i32 to index
      %c0_8 = arith.constant 0 : index
      %c0_9 = arith.constant 0 : index
      %19 = vector.load %arg7[%18, %c0_8, %c0_9] : memref<4x128x128xbf16, #tpu.memory_space<vmem>>, vector<1x128x128xbf16>
      %20 = vector.shape_cast %19 : vector<1x128x128xbf16> to vector<128x128xbf16>
      %cst_10 = arith.constant dense<0.000000e+00> : vector<16x128xf32>
      %21 = tpu.matmul %17, %20, %cst_10 {dimension_numbers = #tpu.dot_dimension_numbers<[1], [0], [0], [1], [0, 0, 1, 1], [], []>} : vector<16x128xbf16>, vector<128x128xbf16>, vector<16x128xf32> -> vector<16x128xf32>
      %22 = arith.addf %16, %21 : vector<16x128xf32>
      %c0_11 = arith.constant 0 : index
      %c0_12 = arith.constant 0 : index
      %23 = vector.load %arg9[%c0_11, %c0_12] : memref<16x128xf32, #tpu.memory_space<vmem>>, vector<16x128xf32>
      tpu.vector_store %arg9[%c0_11, %c0_12], %22 {strides = array<i32>} : memref<16x128xf32, #tpu.memory_space<vmem>>, vector<16x128xf32>,
    } else {
    }
    return
  }
  func.func @transform_0(%arg0: i32, %arg1: memref<4xi32, #tpu.memory_space<smem>>, %arg2: memref<4xi32, #tpu.memory_space<smem>>, %arg3: memref<4xi32, #tpu.memory_space<smem>>, %arg4: memref<4xi32, #tpu.memory_space<smem>>) -> (i32, i32, i32) {
    %0 = arith.index_cast %arg0 : i32 to index
    %1 = memref.load %arg2[%0] : memref<4xi32, #tpu.memory_space<smem>>
    %2 = arith.index_cast %arg0 : i32 to index
    %3 = memref.load %arg1[%2] : memref<4xi32, #tpu.memory_space<smem>>
    %c0_i32 = arith.constant 0 : i32
    %c0_i32_0 = arith.constant 0 : i32
    return %1, %3, %c0_i32 : i32, i32, i32
  }
  func.func @transform_1(%arg0: i32, %arg1: memref<4xi32, #tpu.memory_space<smem>>, %arg2: memref<4xi32, #tpu.memory_space<smem>>, %arg3: memref<4xi32, #tpu.memory_space<smem>>, %arg4: memref<4xi32, #tpu.memory_space<smem>>) -> (i32, i32) {
    %c0_i32 = arith.constant 0 : i32
    %c0_i32_0 = arith.constant 0 : i32
    %c0_i32_1 = arith.constant 0 : i32
    return %c0_i32, %c0_i32_0 : i32, i32
  }
  func.func @transform_2(%arg0: i32, %arg1: memref<4xi32, #tpu.memory_space<smem>>, %arg2: memref<4xi32, #tpu.memory_space<smem>>, %arg3: memref<4xi32, #tpu.memory_space<smem>>, %arg4: memref<4xi32, #tpu.memory_space<smem>>) -> (i32, i32, i32) {
    %c0_i32 = arith.constant 0 : i32
    %c0_i32_0 = arith.constant 0 : i32
    %c0_i32_1 = arith.constant 0 : i32
    %c0_i32_2 = arith.constant 0 : i32
    return %c0_i32, %c0_i32_0, %c0_i32_1 : i32, i32, i32
  }
  func.func @transform_3(%arg0: i32, %arg1: memref<4xi32, #tpu.memory_space<smem>>, %arg2: memref<4xi32, #tpu.memory_space<smem>>, %arg3: memref<4xi32, #tpu.memory_space<smem>>, %arg4: memref<4xi32, #tpu.memory_space<smem>>) -> (i32, i32) {
    %0 = arith.index_cast %arg0 : i32 to index
    %1 = memref.load %arg1[%0] : memref<4xi32, #tpu.memory_space<smem>>
    %c0_i32 = arith.constant 0 : i32
    %c0_i32_0 = arith.constant 0 : i32
    return %1, %c0_i32 : i32, i32
  }
  func.func @transform_4(%arg0: i32, %arg1: memref<4xi32, #tpu.memory_space<smem>>, %arg2: memref<4xi32, #tpu.memory_space<smem>>, %arg3: memref<4xi32, #tpu.memory_space<smem>>, %arg4: memref<4xi32, #tpu.memory_space<smem>>) -> (i32, i32) {
    %0 = arith.index_cast %arg0 : i32 to index
    %1 = memref.load %arg1[%0] : memref<4xi32, #tpu.memory_space<smem>>
    %c0_i32 = arith.constant 0 : i32
    %c0_i32_0 = arith.constant 0 : i32
    return %1, %c0_i32 : i32, i32
  }
}

</mosaic_0001>

<bundles_post_ra>
// kernel: tpu_custom_call.1
= control target key start
LH: loop header
LB: loop body
LE: loop exit
PB: predicated region body
PF: predicated region fallthrough
CT: control target
= control target key end

     0   :  { %s1250_s27 = smov [#allocation3]   ;;  %s1724_s0 = inlined_call_operand.hbm [shape: s32[4], index: 0, kind: input, shape index: {}]   ;;  %s1725_s4 = inlined_call_operand.hbm [shape: bf16[4,16,128], index: 4, kind: input, shape index: {}]   ;;  %s1726_s5 = inlined_call_operand.hbm [shape: bf16[128,128], index: 5, kind: input, shape index: {}]   ;;  %s1727_s6 = inlined_call_operand.hbm [shape: bf16[4,128,128], index: 6, kind: input, shape index: {}]   ;;  %s1728_s7 = inlined_call_operand.hbm [shape: f32[16,128], index: 7, kind: input, shape index: {}]   ;;  %s1729_s8 = inlined_call_operand.hbm [shape: f32[16,128], index: 8, kind: output, shape index: {}]   ;;  %s1730_s1 = inlined_call_operand.vmem [shape: s32[4], index: 1, kind: input, shape index: {}]   ;;  %s1731_s2 = inlined_call_operand.vmem [shape: s32[4], index: 2, kind: input, shape index: {}]   ;;  %s1732_s3 = inlined_call_operand.vmem [shape: s32[4], index: 3, kind: input, shape index: {}]  }
   0x1   :  { %1755 = sst [smem:[#allocation36_spill]] %s1726_s5  ;;  %s15_s10 = sshll.u32 %s1730_s1, 4  ;;  %s16_s10 = int_to_ptr.vmem [resolvable:$true] %s15_s10 }
   0x2   :  { %1756 = sst [smem:[#allocation37_spill]] %s1727_s6  ;;  %s19_s13 = sshll.u32 %s1731_s2, 4  ;;  %s20_s13 = int_to_ptr.vmem [resolvable:$true] %s19_s13 }
   0x3   :  { %1757 = sst [smem:[#allocation38_spill]] %s1729_s8  ;;  %s982_s14 = scalar_lea.vmem %s16_s10, 16 }
   0x4   :  { %14 = dma.hbm_to_smem %s1724_s0, 16, %s1250_s27, [#allocation2] }
   0x5   :  { %p983_p0 = scmp.ne.s32.totalorder %s16_s10, %s982_s14  ;;  %p987_p1 = scmp.lt.s32.totalorder %s16_s10, %s16_s10 }
   0x6   :  { %p988_p2 = scmp.lt.s32.totalorder %s982_s14, %s982_s14 }
   0x8   :  { %p989_p3 = por %p988_p2, %p987_p1 }
   0xa   :  { %p990_p4 = pnand %p989_p3, %p983_p0 }
   0xc   :  { %993 = shalt.err (!%p990_p4)  }
   0xd   :  { %s1251_s15 = smov [#allocation4]   ;;  %s23_s17 = sshll.u32 %s1732_s3, 4  ;;  %s24_s17 = int_to_ptr.vmem [resolvable:$true] %s23_s17 }
   0xe   :  { %18 = dma.vmem_to_smem %s16_s10, 16, %s1251_s15, [#allocation2] }
   0xf   :  { %s994_s1 = scalar_lea.vmem %s20_s13, 16  ;;  %p999_p6 = scmp.lt.s32.totalorder %s20_s13, %s20_s13 }
  0x10   :  { %p995_p5 = scmp.ne.s32.totalorder %s20_s13, %s994_s1  ;;  %p1000_p7 = scmp.lt.s32.totalorder %s994_s1, %s994_s1 }
  0x12   :  { %p1001_p8 = por %p1000_p7, %p999_p6 }
  0x14   :  { %p1002_p9 = pnand %p1001_p8, %p995_p5 }
  0x16   :  { %1005 = shalt.err (!%p1002_p9)  }
  0x17   :  { %s1252_s2 = smov [#allocation5]   ;;  %s1006_s18 = scalar_lea.vmem %s24_s17, 16 }
  0x18   :  { %22 = dma.vmem_to_smem %s20_s13, 16, %s1252_s2, [#allocation2] }
  0x19   :  { %p1007_p10 = scmp.ne.s32.totalorder %s24_s17, %s1006_s18  ;;  %p1011_p11 = scmp.lt.s32.totalorder %s24_s17, %s24_s17 }
  0x1a   :  { %p1012_p12 = scmp.lt.s32.totalorder %s1006_s18, %s1006_s18 }
  0x1c   :  { %p1013_p13 = por %p1012_p12, %p1011_p11 }
  0x1e   :  { %p1014_p0 = pnand %p1013_p13, %p1007_p10 }
  0x20   :  { %1017 = shalt.err (!%p1014_p0)  }
  0x21   :  { %s1253_s19 = smov [#allocation6]  }
  0x22   :  { %26 = dma.vmem_to_smem %s24_s17, 16, %s1253_s19, [#allocation2] }
  0x23   :  { %1192 = dma.done.wait [#allocation2], 64 }
  0x24   :  { %1193 = vsyncadd [#allocation2], 4294967232 }
  0x25   :  { %28 = sfence }
  0x26   :  { %29 = vsyncpa [#allocation8], 0 }
  0x27   :  { %31 = vsyncpa [#allocation8 + $0x1], 0 }
  0x28   :  { %32 = vsyncpa [#allocation11], 0 }
  0x29   :  { %33 = vsyncpa [#allocation14], 0 }
  0x2a   :  { %35 = vsyncpa [#allocation14 + $0x1], 0 }
  0x2b   :  { %36 = vsyncpa [#allocation9], 0 }
  0x2c   :  { %38 = vsyncpa [#allocation9 + $0x1], 0  ;;  %s1324_s3 = smov 0   ;;  %s1326_s20 = smov 0  }
  0x2d   :  { %s1328_s21 = smov 0   ;;  %s1330_s22 = smov 0  }
  0x2e   :  { %s1332_s23 = smov 0   ;;  %s1334_s24 = smov 0  }
  0x2f   :  { %s1336_s25 = smov 0   ;;  %s1338_s26 = smov 0  }
  0x30   :  { %s1340_s27 = smov 0   ;;  %s1342_s28 = smov 0  }
  0x31 LB: > { %1758 = sst [smem:[#allocation28_spill]] %s1212_s3  ;;  %s1371_s29 = sadd.s32 4294967295, %s1248_s28   ;;  %s1248_s28 = sphi %s1342_s28, %s1802_s28   ;;  %s1244_s27 = sphi %s1340_s27, %s1812_s27   ;;  %s1240_s26 = sphi %s1338_s26, %s1811_s26   ;;  %s1236_s25 = sphi %s1336_s25, %s1810_s25   ;;  %s1232_s24 = sphi %s1334_s24, %s1809_s24   ;;  %s1228_s23 = sphi %s1332_s23, %s1808_s23   ;;  %s1224_s22 = sphi %s1330_s22, %s1807_s22   ;;  %s1220_s21 = sphi %s1328_s21, %s1805_s21   ;;  %s1216_s20 = sphi %s1326_s20, %s1804_s20   ;;  %s1212_s3 = sphi %s1324_s3, %s1803_s3  }
  0x32   : > { %1759 = sst [smem:[#allocation29_spill]] %s1216_s20  ;;  %s706_s30 = sadd.s32 4294967294, %s1248_s28  }
  0x33   : > { %1760 = sst [smem:[#allocation30_spill]] %s1220_s21  ;;  %s1375_s9 = sadd.s32 1, %s1248_s28  }
  0x34   : > { %1761 = sst [smem:[#allocation31_spill]] %s1375_s9  ;;  %p70_p1 = scmp.ne.s32.totalorder %s1240_s26, %s1236_s25 }
  0x35   : > { %p1748_p2 = scmp.eq.s32.totalorder %s1371_s29, 0  ;;  %p140_p3 = scmp.ne.s32.totalorder %s1228_s23, %s1224_s22 }
  0x36   : > { %s150_s10 = sld [smem:[#allocation3 + %s1248_s28]]  ;;  %s155_s11 = sadd.s32 1, %s1220_s21 }
  0x37   : > { %p1384_p4 = por %p1748_p2, %p70_p1  ;;  %p1390_p5 = por %p140_p3, %p1748_p2 }
  0x38   : > { %s151_s14 = sld [smem:[#allocation3 + %s1375_s9]]  ;;  %p165_p6 = scmp.ne.s32.totalorder %s1220_s21, %s1216_s20 }
  0x39   : > { %s1762_s12 = scalar_select %p1384_p4, 1, 0 }
  0x3a   : > { %s1763_s13 = scalar_select %p1390_p5, 1, 0 }
  0x3b   : > { %p166_p7 = scmp.eq.s32.totalorder %s1371_s29, 3  ;;  %p171_p8 = scmp.ne.s32.totalorder %s1216_s20, %s1212_s3 }
  0x3c   : > { %p172_p9 = scmp.eq.s32.totalorder %s706_s30, 3  ;;  %p707_p10 = scmp.ge.s32.totalorder %s1248_s28, 1 }
  0x3d   : > { %p1401_p11 = por %p166_p7, %p165_p6  ;;  %p179_p12 = scmp.lt.s32.totalorder %s1248_s28, 5 }
  0x3e   : > { %p1406_p13 = por %p172_p9, %p171_p8  ;;  %s152_s17 = ssub.s32 %s150_s10, %s151_s14 }
  0x3f   : > { %s1764_s15 = scalar_select %p1401_p11, 1, 0 }
  0x40   : > { %s1766_s0 = scalar_select %p1406_p13, 1, 0 }
  0x41   : > { %1765 = sst [smem:[#allocation32_spill]] %s1764_s15  ;;  %p1410_p0 = pnand %p707_p10, %p179_p12 }
  0x42   : > { %1767 = sst [smem:[#allocation33_spill]] %s1766_s0  ;;  %s1254_s1 = smov [#allocation10]  }
  0x43   : > { %s1768_s16 = scalar_select %p1410_p0, 1, 0 }
  0x44   : > { %s191_s2 = sshll.u32 %s1254_s1, 4  ;;  %p153_p1 = scmp.eq.s32.totalorder %s152_s17, 0  ;;  %s192_s2 = int_to_ptr.vmem [resolvable:$true] %s191_s2 }
  0x45   : > { %p833_p3 = pneg %p1410_p0  ;;  %s1255_s22 = smov [#allocation12]  }
  0x46   : > { %s1417_s18 = scalar_select %p153_p1, %s1220_s21, %s155_s11  }
  0x47   : > { %p1421_p6 = pnand %p833_p3, %p1748_p2  ;;  %s204_s25 = sshll.u32 %s1255_s22, 4  ;;  %s205_s25 = int_to_ptr.vmem [resolvable:$true] %s204_s25 }
  0x48   : > { %1769 = sst [smem:[#allocation34_spill]] %s1417_s18  ;;  %s1029_s30 = scalar_lea.vmem %s192_s2, 1024 }
  0x49   : > { %p1020_p7 = pneg %p1421_p6  ;;  %p1030_p8 = scmp.ne.s32.totalorder %s192_s2, %s1029_s30 }
  0x4a   : > { %p1037_p12 = scmp.lt.s32.totalorder %s192_s2, %s192_s2  ;;  %p1038_p1 = scmp.lt.s32.totalorder %s1029_s30, %s1029_s30 }
  0x4b   : > { %p1032_p9 = pnand %p1030_p8, %p1020_p7 }
  0x4c   : > { %p1039_p13 = por %p1038_p1, %p1037_p12 }
  0x4d   : > { %p1033_p10 = pneg %p1032_p9 }
  0x4f   : > { %p1040_p11 = pnand %p1039_p13, %p1033_p10 }
  0x51   : > { %1043 = shalt.err (!%p1040_p11)
}
  0x52   : > { %s1734_s10 = smov 64   ;;  %s1735_s11 = smov 4  }
  0x53   : > { %s1771_s5 = sld [smem:[#allocation36_spill]]  ;;  %s1055_s1 = scalar_lea.vmem %s205_s25, 4096 }
  0x54   : > { %p1056_p3 = scmp.ne.s32.totalorder %s205_s25, %s1055_s1  ;;  %p1063_p11 = scmp.lt.s32.totalorder %s205_s25, %s205_s25 }
  0x55   : > { %p1064_p9 = scmp.lt.s32.totalorder %s1055_s1, %s1055_s1 }
  0x56   : > { %p1058_p8 = pnand %p1056_p3, %p1020_p7 }
  0x57   : > { %p1065_p10 = por %p1064_p9, %p1063_p11 }
  0x58   : > { %p1059_p13 = pneg %p1058_p8 }
  0x59   : > { %836 = dma.hbm_to_vmem [thread:$0]  (!%p1421_p6), %s1771_s5, 1024, %s192_s2, [#allocation11], %s1734_s10, %s1734_s10, %s1735_s11  }
  0x5a   : > { %p1066_p12 = pnand %p1065_p10, %p1059_p13 }
  0x5c   : > { %1069 = shalt.err (!%p1066_p12)
}
  0x5d   : > { %s1772_s6 = sld [smem:[#allocation37_spill]]  ;;  %p64_p7 = scmp.ne.s32.totalorder %s1244_s27, %s1240_s26 }
  0x5e   : > { %s48_s2 = sld [smem:[#allocation4 + %s1248_s28]]  ;;  %p65_p1 = scmp.eq.s32.totalorder %s1248_s28, 0 }
  0x5f   : > { %s49_s19 = sld [smem:[#allocation3 + %s1248_s28]]  ;;  %s1736_s1 = sand.u32 1, %s1244_s27  }
  0x60   : > { %s50_s14 = sld [smem:[#allocation4 + %s1375_s9]]  ;;  %p1459_p3 = por %p65_p1, %p64_p7 }
  0x61   : > { %s51_s17 = sld [smem:[#allocation3 + %s1375_s9]]  ;;  %s57_s30 = sadd.s32 1, %s1244_s27 }
  0x62   : > { %s815_s18 = scalar_select %p1459_p3, [#allocation4], [#allocation16] }
  0x63   : > { %839 = dma.hbm_to_vmem [thread:$0]  (!%p1421_p6), %s1772_s6, 4096, %s205_s25, [#allocation11], %s1734_s10, %s1734_s10, %s1735_s11  }
  0x64   : > { %p1749_p6 = scmp.lt.s32.totalorder %s1248_s28, 4  ;;  %s711_s25 = sshll.u32 %s1736_s1, 3 }
  0x65   : > { %s816_s21 = scalar_select %p1459_p3, %s1248_s28, 0 }
  0x66   : > { %p1471_p8 = pnand %p1749_p6, %p1459_p3  ;;  %s52_s11 = ssub.s32 %s48_s2, %s50_s14 }
  0x67   : > { %s53_s5 = ssub.s32 %s49_s19, %s51_s17  ;;  %s1814_s18 = smov (!%p1749_p6, %s815_s18), [#allocation20] }
  0x68   : > { %s54_s6 = sor.u32 %s53_s5, %s52_s11  ;;  %s1816_s21 = smov (!%p1749_p6, %s816_s21), 0 }
  0x69   : > { %p55_p13 = scmp.eq.s32.totalorder %s54_s6, 0  ;;  %s223_s19 = sld [smem:[%s1814_s18 + %s1816_s21]] }
  0x6a   : > { %s817_s2 = scalar_select %p1459_p3, [#allocation3], [#allocation17] }
  0x6b   : > { %s1478_s1 = scalar_select %p55_p13, %s1244_s27, %s57_s30  }
  0x6c   : > { %s222_s5 = scalar_lea.vmem [#allocation7], %s711_s25  ;;  %s1818_s2 = smov (!%p1749_p6, %s817_s2), [#allocation21] }
  0x6d   : > { %1775 = sst [smem:[#allocation35_spill]] %s1478_s1  ;;  %s233_s11 = sshll.u32 %s222_s5, 4  ;;  %s1501_s11 = int_to_ptr.vmem [resolvable:$true] %s233_s11 }
  0x6e   : > { %s122_s6 = sld [smem:[#allocation3 + %s1248_s28]]  ;;  %p134_p11 = scmp.ne.s32.totalorder %s1232_s24, %s1228_s23 }
  0x6f   : > { %s224_s14 = sld [smem:[%s1818_s2 + %s1816_s21]]  ;;  %s713_s22 = sshll.u32 %s223_s19, 1 }
  0x70   : > { %s123_s17 = sld [smem:[#allocation3 + %s1375_s9]]  ;;  %p1497_p9 = por %p134_p11, %p65_p1 }
  0x71   : > { %s1747_s25 = sand.u32 1, %s1232_s24   ;;  %s1778_s18 = sand.u32 1, %s1244_s27  }
  0x72   : > { %s1776_s30 = scalar_select %p1497_p9, 1, 0 }
  0x73   : > { %s820_s5 = scalar_select %p1497_p9, [#allocation3], [#allocation18] }
  0x74   : > { %s821_s1 = scalar_select %p1497_p9, %s1248_s28, 0 }
  0x75   : > { %s712_s21 = sshll.u32 %s224_s14, 1  ;;  %s1512_s2 = sshll.u32 %s1747_s25, 4 }
  0x76   : > { %s230_s9 = sadd.s32 %s713_s22, %s712_s21  ;;  %s124_s0 = ssub.s32 %s122_s6, %s123_s17 }
  0x77   : > { %s714_s3 = sshll.u32 %s230_s9, 6  ;;  %p1514_p10 = scmp.eq.s32.totalorder %s124_s0, 0 }
  0x78   : > { %s1521_s19 = scalar_lea.hbm %s1725_s4, %s714_s3  ;;  %s1525_s14 = scalar_lea.sflag [#allocation8], %s1778_s18 }
  0x79   : > { %s1777_s8 = scalar_select %p1514_p10, 1, 0 }
  0x7a   : > { %s1070_s25 = scalar_lea.hbm %s1521_s19, 128  ;;  %p1072_p7 = pneg %p1471_p8 }
  0x7b   : > { %p1071_p12 = scmp.ne.s32.totalorder %s1521_s19, %s1070_s25  ;;  %s1075_s6 = scalar_lea.hbm %s1725_s4, 512 }
  0x7c   : > { %p1076_p13 = scmp.lt.s32.totalorder %s1521_s19, %s1725_s4  ;;  %p1077_p11 = scmp.lt.s32.totalorder %s1075_s6, %s1070_s25 }
  0x7d   : > { %p1073_p1 = pnand %p1072_p7, %p1071_p12 }
  0x7e   : > { %p1078_p2 = por %p1077_p11, %p1076_p13 }
  0x7f   : > { %p1074_p3 = pneg %p1073_p1 }
  0x81   : > { %p1079_p6 = pnand %p1078_p2, %p1074_p3 }
  0x83   : > { %1082 = shalt.err (!%p1079_p6)
}
  0x84   : > { %s1083_s3 = scalar_lea.vmem %s1501_s11, 128  ;;  %s1258_s15 = smov [#allocation7]  }
  0x85   : > { %p1084_p5 = scmp.ne.s32.totalorder %s1501_s11, %s1083_s3  ;;  %s1088_s18 = sshll.u32 %s1258_s15, 4  ;;  %s1089_s18 = int_to_ptr.vmem [resolvable:$false] %s1088_s18 }
  0x86   : > { %s1090_s22 = scalar_lea.vmem %s1089_s18, 256  ;;  %p1091_p1 = scmp.lt.s32.totalorder %s1501_s11, %s1089_s18 }
  0x87   : > { %p1086_p4 = pnand %p1084_p5, %p1072_p7  ;;  %p1092_p0 = scmp.lt.s32.totalorder %s1090_s22, %s1083_s3 }
  0x89   : > { %p1087_p12 = pneg %p1086_p4  ;;  %p1093_p9 = por %p1092_p0, %p1091_p1 }
  0x8b   : > { %p1094_p10 = pnand %p1093_p9, %p1087_p12 }
  0x8d   : > { %1097 = shalt.err (!%p1094_p10)
}
  0x8e   : > { %s1779_s25 = smov 4   ;;  %s1780_s21 = smov 64  }
  0x8f   : > { %847 = dma.hbm_to_vmem [thread:$0]  (!%p1471_p8), %s1521_s19, 128, %s1501_s11, %s1525_s14, %s1780_s21, %s1780_s21, %s1779_s25  }
  0x90   : > { %s1781_s10 = sadd.s32 1, %s1232_s24  ;;  %p1782_p2 = scmp.ne.s32.totalorder %s1777_s8, 0 }
  0x91   : > { %p1783_p4 = scmp.ne.s32.totalorder %s1776_s30, 0  ;;  %p1784_p5 = scmp.lt.s32.totalorder %s1248_s28, 4 }
  0x92   : > { %s1554_s9 = scalar_select %p1782_p2, %s1232_s24, %s1781_s10  }
  0x93   : > { %s1820_s5 = smov (!%p1784_p5, %s820_s5), [#allocation22]  ;;  %p1785_p0 = pmov %p1784_p5 }
  0x94   : > { %s247_s19 = scalar_lea.vmem [#allocation13], %s1512_s2  ;;  %s1788_s3 = sand.u32 1, %s1232_s24  }
  0x95   : > { %s1822_s1 = smov (!%p1785_p0, %s821_s1), 0  ;;  %p1786_p6 = pmov %p1785_p0 }
  0x96   : > { %s248_s11 = sld [smem:[%s1820_s5 + %s1822_s1]]  ;;  %s255_s8 = sshll.u32 %s247_s19, 4  ;;  %s1576_s8 = int_to_ptr.vmem [resolvable:$true] %s255_s8 }
  0x97   : > { %p1571_p9 = pnand %p1786_p6, %p1783_p4  ;;  %s1585_s30 = scalar_lea.sflag [#allocation14], %s1788_s3 }
  0x98   : > { %s1103_s2 = scalar_lea.hbm %s1728_s7, 256 }
  0x99   : > { %p1100_p10 = pneg %p1571_p9 }
  0x9c   : > { %s750_s14 = sshll.u32 %s248_s11, 8 }
  0x9d   : > { %s1581_s20 = scalar_lea.hbm %s1728_s7, %s750_s14 }
  0x9e   : > { %s1098_s15 = scalar_lea.hbm %s1581_s20, 256  ;;  %p1104_p13 = scmp.lt.s32.totalorder %s1581_s20, %s1728_s7 }
  0x9f   : > { %p1099_p8 = scmp.ne.s32.totalorder %s1581_s20, %s1098_s15  ;;  %p1105_p11 = scmp.lt.s32.totalorder %s1103_s2, %s1098_s15 }
  0xa1   : > { %p1101_p7 = pnand %p1100_p10, %p1099_p8  ;;  %p1106_p12 = por %p1105_p11, %p1104_p13 }
  0xa3   : > { %p1102_p3 = pneg %p1101_p7 }
  0xa5   : > { %p1107_p1 = pnand %p1106_p12, %p1102_p3 }
  0xa7   : > { %1110 = shalt.err (!%p1107_p1)
}
  0xa8   : > { %s1111_s25 = scalar_lea.vmem %s1576_s8, 256  ;;  %s1259_s21 = smov [#allocation13]  }
  0xa9   : > { %p1112_p2 = scmp.ne.s32.totalorder %s1576_s8, %s1111_s25  ;;  %s1116_s10 = sshll.u32 %s1259_s21, 4  ;;  %s1117_s10 = int_to_ptr.vmem [resolvable:$false] %s1116_s10 }
  0xaa   : > { %s1118_s11 = scalar_lea.vmem %s1117_s10, 512  ;;  %p1119_p0 = scmp.lt.s32.totalorder %s1576_s8, %s1117_s10 }
  0xab   : > { %p1114_p4 = pnand %p1112_p2, %p1100_p10  ;;  %p1120_p6 = scmp.lt.s32.totalorder %s1118_s11, %s1111_s25 }
  0xad   : > { %p1115_p5 = pneg %p1114_p4  ;;  %p1121_p8 = por %p1120_p6, %p1119_p0 }
  0xaf   : > { %p1122_p7 = pnand %p1121_p8, %p1115_p5 }
  0xb1   : > { %1125 = shalt.err (!%p1122_p7)
}
  0xb2   : > { %s1260_s19 = smov 128   ;;  %s1261_s14 = smov 8  }
  0xb3   : > { %852 = dma.hbm_to_vmem [thread:$0]  (!%p1571_p9), %s1581_s20, 256, %s1576_s8, %s1585_s30, %s1260_s19, %s1260_s19, %s1261_s14  }
  0xb4   : > { %p1789_p10 = scmp.ne.s32.totalorder %s1768_s16, 0 }
  0xb5   : > { %s269_s6 = sand.u32 (!%p1789_p10), 1, %s1240_s26   ;;  %p1790_p3 = scmp.ne.s32.totalorder (!%p1789_p10), %s1762_s12, 0 }
  0xb6   : > { %267 = sbr.rel (%p1789_p10) target bundleno = 689 (0x2b1), region = 36  ;;  %s1609_s17 = sshll.u32 (!%p1789_p10), %s269_s6, 3 }
  0xb7   : > { %s270_s3 = scalar_lea.sflag (!%p1789_p10), [#allocation8], %s269_s6  ;;  %s273_s15 = scalar_lea.vmem (!%p1789_p10), [#allocation7], %s1609_s17 }
  0xbb   : > { %1195 = dma.done.wait (%p1790_p3), %s270_s3, 128  }
  0xbc   : > { %1197 = vsyncadd (%p1790_p3), %s270_s3, 4294967168  ;;  %p1791_p13 = scmp.eq.s32.totalorder %s1371_s29, 0 }
  0xbe   : > { %1199 = dma.done.wait (%p1791_p13), [#allocation11], 5120   ;;  %p1792_p9 = pmov %p1791_p13 }
  0xbf   : > { %s286_s16 = sand.u32 1, %s1228_s23   ;;  %p1793_p11 = scmp.ne.s32.totalorder %s1763_s13, 0 }
  0xc0   : > { %1201 = vsyncadd (%p1792_p9), [#allocation11], 4294962176  ;;  %s722_s0 = sshll.u32 %s286_s16, 4  ;;  %s287_s8 = scalar_lea.sflag [#allocation14], %s286_s16 }
  0xc1   : > { %s290_s20 = scalar_lea.vmem [#allocation13], %s722_s0 }
  0xc2   : > { %1203 = dma.done.wait (%p1793_p11), %s287_s8, 256  }
  0xc3   : > { %1205 = vsyncadd (%p1793_p11), %s287_s8, 4294967040  ;;  %s1794_s30 = sld [smem:[#allocation29_spill]] }
  0xc4   : > { %s328_s1 = sld [smem:[#allocation4 + %s1371_s29]] }
  0xc5   : > { %s329_s2 = sld [smem:[#allocation5 + %s1371_s29]] }
  0xc9   : > { %s317_s12 = sand.u32 1, %s1794_s30  }
  0xca   : > { %s723_s5 = sshll.u32 %s317_s12, 4 }
  0xcb   : > { %s1630_s18 = scalar_lea.vmem [#allocation15], %s723_s5  ;;  %p724_p12 = scmp.ne.s32.totalorder %s329_s2, 1 }
  0xcd   : > { %333 = sbr.rel (%p724_p12) target bundleno = 212 (0xd4), region = 56 }
  0xd2   : > { %v334_v0 = vld [vmem:[%s290_s20] sm:$0xff]  ;;  %v335_v1 = vld [vmem:[%s290_s20 + $0x8] sm:$0xff] }
  0xd3   : > { %336 = vst [vmem:[%s1630_s18] sm:$0xff] %v334_v0  ;;  %337 = vst [vmem:[%s1630_s18 + $0x8] sm:$0xff] %v335_v1 }
  0xd4 PF: > { %s338_s13 = sld [smem:[#allocation6 + %s1371_s29]] }
  0xda   : > { %p725_p1 = scmp.ne.s32.totalorder %s338_s13, 1 }
  0xdb   : > { %s751_s22 = sshll.u32 (!%p725_p1), %s328_s1, 6 }
  0xdc   : > { %342 = sbr.rel (%p725_p1) target bundleno = 657 (0x291), region = 60  ;;  %s1635_s25 = scalar_lea.vmem (!%p725_p1), [#allocation12], %s751_s22 }
  0xe1   : > { %v957_v2 = vld [vmem:[#allocation10 + $0x38] sm:$0xff]   ;;  %v1262_v3 = vmov 0.0   ;;  %v958_v4 = vld [vmem:[#allocation10 + $0x30] sm:$0xff]   ;;  %vm1263_vm0 = vmmov 0   ;;  %v959_v5 = vld [vmem:[#allocation10 + $0x28] sm:$0xff]  }
  0xe2   : > { %771 = vmatprep.subr.bf16.mxu0 %v1262_v3  ;;  %791 = vmatprep.subr.bf16.mxu1 %v1262_v3  ;;  %v966_v6 = vld [vmem:[%s1635_s25 + $0x38] sm:$0xff]   ;;  %v960_v7 = vld [vmem:[#allocation10 + $0x20] sm:$0xff]   ;;  %v961_v9 = vld [vmem:[#allocation10 + $0x18] sm:$0xff]  }
  0xe3   : > { %772 = vmatpush3.bf16.msra.mxu0 %v957_v2  ;;  %787 = vmatprep.mubr.msk.bf16.mxu0 %vm1263_vm0, %v1262_v3  ;;  %v967_v8 = vld [vmem:[%s1635_s25 + $0x30] sm:$0xff]   ;;  %v968_v10 = vld [vmem:[%s1635_s25 + $0x28] sm:$0xff]   ;;  %v962_v11 = vld [vmem:[#allocation10 + $0x10] sm:$0xff]  }
  0xe4   : > { %773 = vmatprep.subr.bf16.mxu0 %v1262_v3  ;;  %807 = vmatprep.mubr.msk.bf16.mxu1 %vm1263_vm0, %v1262_v3  ;;  %v969_v12 = vld [vmem:[%s1635_s25 + $0x20] sm:$0xff]   ;;  %v963_v13 = vld [vmem:[#allocation10 + $0x8] sm:$0xff]   ;;  %v964_v15 = vld [vmem:[#allocation10] sm:$0xff]  }
  0xe5   : > { %792 = vmatpush3.bf16.msra.mxu1 %v966_v6  ;;  %v970_v14 = vld [vmem:[%s1635_s25 + $0x18] sm:$0xff]   ;;  %v971_v16 = vld [vmem:[%s1635_s25 + $0x10] sm:$0xff]   ;;  %v965_v17 = vld [vmem:[%s273_s15] sm:$0xff]  }
  0xe6   : > { %793 = vmatprep.subr.bf16.mxu1 %v1262_v3  ;;  %v972_v18 = vld [vmem:[%s1635_s25 + $0x8] sm:$0xff]   ;;  %v973_v19 = vld [vmem:[%s1635_s25] sm:$0xff]  }
  0xe7   : > { %774 = vmatpush3.bf16.msra.mxu0 %v958_v4  ;;  %v456_v25 = vld [vmem:[%s1630_s18] sm:$0xff]  ;;  %v457_v29 = vld [vmem:[%s1630_s18 + $0x8] sm:$0xff] }
  0xe8   : > { %775 = vmatprep.subr.bf16.mxu0 %v1262_v3 }
  0xe9   : > { %794 = vmatpush3.bf16.msra.mxu1 %v967_v8 }
  0xea   : > { %795 = vmatprep.subr.bf16.mxu1 %v1262_v3 }
  0xeb   : > { %776 = vmatpush3.bf16.msra.mxu0 %v959_v5 }
  0xec   : > { %777 = vmatprep.subr.bf16.mxu0 %v1262_v3 }
  0xed   : > { %796 = vmatpush3.bf16.msra.mxu1 %v968_v10 }
  0xee   : > { %797 = vmatprep.subr.bf16.mxu1 %v1262_v3 }
  0xef   : > { %778 = vmatpush3.bf16.msra.mxu0 %v960_v7 }
  0xf0   : > { %779 = vmatprep.subr.bf16.mxu0 %v1262_v3 }
  0xf1   : > { %798 = vmatpush3.bf16.msra.mxu1 %v969_v12 }
  0xf2   : > { %799 = vmatprep.subr.bf16.mxu1 %v1262_v3 }
  0xf3   : > { %780 = vmatpush3.bf16.msra.mxu0 %v961_v9 }
  0xf4   : > { %781 = vmatprep.subr.bf16.mxu0 %v1262_v3 }
  0xf5   : > { %800 = vmatpush3.bf16.msra.mxu1 %v970_v14 }
  0xf6   : > { %801 = vmatprep.subr.bf16.mxu1 %v1262_v3 }
  0xf7   : > { %782 = vmatpush3.bf16.msra.mxu0 %v962_v11 }
  0xf8   : > { %783 = vmatprep.subr.bf16.mxu0 %v1262_v3 }
  0xf9   : > { %802 = vmatpush3.bf16.msra.mxu1 %v971_v16 }
  0xfa   : > { %803 = vmatprep.subr.bf16.mxu1 %v1262_v3 }
  0xfb   : > { %784 = vmatpush3.bf16.msra.mxu0 %v963_v13 }
  0xfc   : > { %785 = vmatprep.subr.bf16.mxu0 %v1262_v3 }
  0xfd   : > { %804 = vmatpush3.bf16.msra.mxu1 %v972_v18 }
  0xfe   : > { %805 = vmatprep.subr.bf16.mxu1 %v1262_v3 }
  0xff   : > { %786 = vmatpush3.bf16.msra.mxu0 %v964_v15 }
 0x101   : > { %806 = vmatpush3.bf16.msra.mxu1 %v973_v19 }
 0x102   : > { %788 = vmatmul.mubr.bf16.vlgmr.msra.gmra.mxu0 %v965_v17 }
 0x1c2   : > { %v449_v20 = vpop.f32.mrf.mxu0 }
 0x1c4   : > { %v789_v21 = vpop.f32.mrf.mxu0 }
 0x1c6   : > { %v452_v22 = vpop.f32.mrf.mxu0 }
 0x1c7   : > { %v458_v23 = vpack.c.bf16 %v452_v22, %v449_v20 }
 0x1c8   : > { %v790_v24 = vpop.f32.mrf.mxu0 }
 0x1c9   : > { %808 = vmatmul.mubr.bf16.vlgmr.msra.gmra.mxu1 %v458_v23 }
 0x289   : > { %v560_v26 = vpop.f32.mrf.mxu1 }
 0x28a   : > { %v567_v27 = vadd.f32 %v560_v26, %v456_v25 }
 0x28b   : > { %v809_v28 = vpop.f32.mrf.mxu1 }
 0x28c   : > { %569 = vst [vmem:[%s1630_s18] sm:$0xff] %v567_v27 }
 0x28d   : > { %v563_v30 = vpop.f32.mrf.mxu1 }
 0x28e   : > { %v568_v31 = vadd.f32 %v563_v30, %v457_v29 }
 0x28f   : > { %v810_v32 = vpop.f32.mrf.mxu1 }
 0x290   : > { %570 = vst [vmem:[%s1630_s18 + $0x8] sm:$0xff] %v568_v31 }
 0x291 PF: > { %s1795_s21 = sld [smem:[#allocation32_spill]]  ;;  %s586_s14 = sshll.u32 %s1630_s18, 4  ;;  %s1657_s14 = int_to_ptr.vmem [resolvable:$true] %s586_s14 }
 0x292   : > { %s1798_s15 = sld [smem:[#allocation38_spill]]  ;;  %s1666_s0 = scalar_lea.sflag [#allocation9], %s317_s12 }
 0x293   : > { %s1126_s8 = scalar_lea.vmem %s1657_s14, 256 }
 0x294   : > { %p1127_p4 = scmp.ne.s32.totalorder %s1657_s14, %s1126_s8 }
 0x297   : > { %p1796_p2 = scmp.ne.s32.totalorder %s1795_s21, 0 }
 0x299   : > { %s829_s11 = scalar_select %p1796_p2, [#allocation3], [#allocation19] }
 0x29a   : > { %s1824_s29 = smov (!%p1796_p2, %s1371_s29), 0  ;;  %p1128_p5 = pnand %p1127_p4, %p1796_p2 }
 0x29b   : > { %s579_s19 = sld [smem:[%s829_s11 + %s1824_s29]]  ;;  %s1264_s29 = smov [#allocation15]  }
 0x29c   : > { %p1129_p0 = pneg %p1128_p5  ;;  %s1130_s20 = sshll.u32 %s1264_s29, 4  ;;  %s1131_s20 = int_to_ptr.vmem [resolvable:$false] %s1130_s20 }
 0x29d   : > { %s1132_s30 = scalar_lea.vmem %s1131_s20, 512  ;;  %p1133_p6 = scmp.lt.s32.totalorder %s1657_s14, %s1131_s20 }
 0x29e   : > { %p1134_p8 = scmp.lt.s32.totalorder %s1132_s30, %s1126_s8 }
 0x2a0   : > { %p1135_p7 = por %p1134_p8, %p1133_p6 }
 0x2a1   : > { %s752_s6 = sshll.u32 %s579_s19, 8 }
 0x2a2   : > { %s1662_s16 = scalar_lea.hbm %s1798_s15, %s752_s6  ;;  %p1136_p10 = pnand %p1135_p7, %p1129_p0 }
 0x2a4   : > { %1139 = shalt.err (!%p1136_p10)
}
 0x2a5   : > { %s1140_s12 = scalar_lea.hbm %s1662_s16, 256  ;;  %s1144_s2 = scalar_lea.hbm %s1798_s15, 256 }
 0x2a6   : > { %p1141_p3 = scmp.ne.s32.totalorder %s1662_s16, %s1140_s12  ;;  %p1145_p11 = scmp.lt.s32.totalorder %s1662_s16, %s1798_s15 }
 0x2a7   : > { %p1146_p12 = scmp.lt.s32.totalorder %s1144_s2, %s1140_s12 }
 0x2a8   : > { %p1142_p13 = pnand %p1141_p3, %p1796_p2 }
 0x2a9   : > { %p1147_p1 = por %p1146_p12, %p1145_p11 }
 0x2aa   : > { %p1143_p9 = pneg %p1142_p13 }
 0x2ac   : > { %p1148_p4 = pnand %p1147_p1, %p1143_p9 }
 0x2ae   : > { %1151 = shalt.err (!%p1148_p4)
}
 0x2af   : > { %s1265_s22 = smov 128   ;;  %s1266_s25 = smov 8  }
 0x2b0   : > { %831 = dma.vmem_to_hbm [thread:$0]  (%p1796_p2), %s1657_s14, 256, %s1662_s16, %s1666_s0, %s1265_s22, %s1265_s22, %s1266_s25  }
 0x2b1 PF: > { %s1799_s10 = sld [smem:[#allocation28_spill]]  ;;  %p862_p5 = scmp.ge.s32.totalorder %s1248_s28, 2 }
 0x2b2   : > { %s1800_s11 = sld [smem:[#allocation33_spill]] }
 0x2b7   : > { %s601_s19 = sand.u32 1, %s1799_s10  }
 0x2b8   : > { %p1801_p0 = scmp.ne.s32.totalorder %s1800_s11, 0  ;;  %s602_s6 = scalar_lea.sflag [#allocation9], %s601_s19 }
 0x2ba   : > { %p854_p6 = pnand %p862_p5, %p1801_p0 }
 0x2bc   : > { %p855_p8 = pneg %p854_p6 }
 0x2be   : > { %1207 = dma.done.wait (%p855_p8), %s602_s6, 256  }
 0x2bf   : > { %1209 = vsyncadd (%p855_p8), %s602_s6, 4294967040  ;;  %s1802_s28 = sld [smem:[#allocation31_spill]]  ;;  %s1807_s22 = smov %s1228_s23 }
 0x2c0   : > { %s1803_s3 = sld [smem:[#allocation29_spill]]  ;;  %s1808_s23 = smov %s1232_s24 }
 0x2c1   : > { %s1804_s20 = sld [smem:[#allocation30_spill]]  ;;  %s1809_s24 = smov %s1554_s9 }
 0x2c2   : > { %s1805_s21 = sld [smem:[#allocation34_spill]]  ;;  %s1810_s25 = smov %s1240_s26 }
 0x2c3   : > { %s1806_s14 = sld [smem:[#allocation35_spill]]  ;;  %s1811_s26 = smov %s1244_s27 }
 0x2c5   : > { %p41_p2 = scmp.ge.s32.totalorder %s1802_s28, 6  }
 0x2c7   :  { %43 = sbr.rel (!%p41_p2) target bundleno = 49 (0x31), region = 111 }
 0x2c9   : > { %s1812_s27 = smov %s1806_s14 }
 0x2cc   :  { %607 = vsyncpa [#allocation8], 1 }
 0x2cd   :  { %609 = vsyncpa [#allocation8 + $0x1], 1 }
 0x2ce   :  { %610 = vsyncpa [#allocation11], 1 }
 0x2cf   :  { %611 = vsyncpa [#allocation14], 1 }
 0x2d0   :  { %613 = vsyncpa [#allocation14 + $0x1], 1 }
 0x2d1   :  { %614 = vsyncpa [#allocation9], 1 }
 0x2d2   :  { %616 = vsyncpa [#allocation9 + $0x1], 1 }

</bundles_post_ra>
